<compile_context>
chip_gen: v7x
topology: tpu7x:2x2x1
jax: 0.10.0
libtpu: 0.0.40
codegen_flags: <defaults>
</compile_context>

<pallas_src>
import jax
import jax.numpy as jnp
from jax.experimental import pallas as pl
from jax.experimental.pallas import tpu as pltpu


_TARGET_TILE_BYTES = 2 << 20   # ~2 MiB of x per block
_VMEM_LIMIT_BYTES = 32 << 20   # safe on every TPU generation (v7x: 64 MiB physical)


def _dephase_kernel(x_re_ref, x_im_ref, p_re_ref, p_im_ref, out_ref):
    # x_*: (bn, bc, D); p_*: (bn, D) -> broadcast over the channel axis.
    # real(x * conj(p)) = x_re * p_re + x_im * p_im
    p_re = p_re_ref[...][:, None, :]
    p_im = p_im_ref[...][:, None, :]
    out_ref[...] = x_re_ref[...] * p_re + x_im_ref[...] * p_im


def _num_tensorcores():
    """Best-effort TensorCores-per-chip count (v7x: 2, v5e/v6e: 1)."""
    try:
        info = pltpu.get_tpu_info()
        for name in ("num_cores", "tensorcores_per_chip", "core_count"):
            val = getattr(info, name, None)
            if val:
                return int(val)
    except Exception:
        pass
    try:
        return int(getattr(jax.devices()[0], "num_cores", 1) or 1)
    except Exception:
        return 1


def _round_down8(v):
    return (v // 8) * 8


def _pick_blocks(N, C, D, itemsize, num_cores, target_bytes=_TARGET_TILE_BYTES):
    """Block sizes (bn, bc) for x/out blocks (bn, bc, D) and phase blocks (bn, D).

    Invariants (keep every BlockSpec (8,128)-legal):
      * bn == N  or  bn % 8 == 0
      * bc == C  or  bc % 8 == 0
      * last block dim is always the full D.
    """
    row_bytes = max(1, C * D * itemsize)

    if N * row_bytes <= target_bytes:
        bn, bc = N, C                               # whole problem in one tile
    else:
        bn = max(1, target_bytes // row_bytes)
        if bn >= 8:
            bn = min(N, _round_down8(bn))
            bc = C
        else:
            # A few batch rows already exceed the target: tile C as well.
            bn = min(N, 8)
            bc = max(1, target_bytes // max(1, bn * D * itemsize))
            bc = min(C, max(8, _round_down8(bc))) if C > 8 else C

    if num_cores > 1:
        # Multi-TensorCore chip: make sure the ("parallel","parallel") grid
        # has at least `num_cores` reasonably balanced steps to shard.
        steps = pl.cdiv(N, bn) * pl.cdiv(C, bc)
        if steps < num_cores:
            if N >= 8 * num_cores:
                bn = max(8, _round_down8(N // num_cores))
            elif C >= 8 * num_cores:
                bc = max(8, _round_down8(C // num_cores))
            # else: problem too small to split with aligned blocks; keep one
            # step (forcing a split on such tiny work is pure overhead).
    return int(bn), int(bc)


def dephase(x_re, x_im, phase_re, phase_im):
    """Real part of x * conj(phase[:, None, :]).

    x_re, x_im:         [N, C, D] float32
    phase_re, phase_im: [N, D]    float32
    returns:            [N, C, D] float32
    """
    N, C, D = x_re.shape
    itemsize = jnp.dtype(x_re.dtype).itemsize
    bn, bc = _pick_blocks(N, C, D, itemsize, _num_tensorcores())

    grid = (pl.cdiv(N, bn), pl.cdiv(C, bc))
    x_spec = pl.BlockSpec((bn, bc, D), lambda n, c: (n, c, 0))
    p_spec = pl.BlockSpec((bn, D), lambda n, c: (n, 0))
    o_spec = pl.BlockSpec((bn, bc, D), lambda n, c: (n, c, 0))

    return pl.pallas_call(
        _dephase_kernel,
        out_shape=jax.ShapeDtypeStruct((N, C, D), x_re.dtype),
        grid_spec=pltpu.PrefetchScalarGridSpec(
            num_scalar_prefetch=0,
            grid=grid,
            in_specs=[x_spec, x_spec, p_spec, p_spec],
            out_specs=o_spec,
        ),
        compiler_params=pltpu.CompilerParams(
            dimension_semantics=("parallel", "parallel"),
            vmem_limit_bytes=_VMEM_LIMIT_BYTES,
        ),
    )(x_re, x_im, phase_re, phase_im)


def dephase_module(data, input_key="q_mu", phase_key="phase", output_key="dephased"):
    """Dict-in / dict-out wrapper mirroring the nn.Module forward.

    Complex tensors are represented as (real, imag) tuples of float32 arrays.
    """
    x_re, x_im = data[input_key]
    p_re, p_im = data[phase_key]
    data[output_key] = dephase(x_re, x_im, p_re, p_im)
    return data


if __name__ == "__main__":
    key = jax.random.PRNGKey(0)
    k1, k2, k3, k4 = jax.random.split(key, 4)

    N, C, D = 4, 8, 128  # batch, channel (unsqueeze(1) axis), feature dim
    x_re = jax.random.normal(k1, (N, C, D), dtype=jnp.float32)
    x_im = jax.random.normal(k2, (N, C, D), dtype=jnp.float32)
    p_re = jax.random.normal(k3, (N, D), dtype=jnp.float32)
    p_im = jax.random.normal(k4, (N, D), dtype=jnp.float32)

    data = {"q_mu": (x_re, x_im), "phase": (p_re, p_im)}
    data = dephase_module(data, input_key="q_mu")
    out = data["dephased"]
    jax.block_until_ready(out)

    # Reference check against complex math in plain JAX.
    x_c = x_re + 1j * x_im
    p_c = p_re + 1j * p_im
    ref = jnp.real(x_c * jnp.conj(p_c)[:, None, :])
    assert jnp.allclose(out, ref, atol=1e-5, rtol=1e-5)

    print("KERNEL_OK")
</pallas_src>

<mosaic_0001>
module attributes {stable_mosaic.version = 11 : i64} {
  func.func @_dephase_kernel(%arg0: i32, %arg1: i32, %arg2: memref<4x8x128xf32, #tpu.memory_space<vmem>>, %arg3: memref<4x8x128xf32, #tpu.memory_space<vmem>>, %arg4: memref<4x128xf32, #tpu.memory_space<vmem>>, %arg5: memref<4x128xf32, #tpu.memory_space<vmem>>, %arg6: memref<4x8x128xf32, #tpu.memory_space<vmem>>) attributes {dimension_semantics = [#tpu.dimension_semantics<parallel>, #tpu.dimension_semantics<parallel>], iteration_bounds = array<i64: 1, 1>, scalar_prefetch = 0 : i64, scratch_operands = 0 : i64, tpu.core_type = #tpu.core_type<tc>, window_params = [{transform_indices = @transform_0, window_bounds = array<i64: 4, 8, 128>}, {transform_indices = @transform_1, window_bounds = array<i64: 4, 8, 128>}, {transform_indices = @transform_2, window_bounds = array<i64: 4, 128>}, {transform_indices = @transform_3, window_bounds = array<i64: 4, 128>}, {transform_indices = @transform_4, window_bounds = array<i64: 4, 8, 128>}]} {
    %c0 = arith.constant 0 : index
    %c0_0 = arith.constant 0 : index
    %0 = vector.load %arg4[%c0, %c0_0] : memref<4x128xf32, #tpu.memory_space<vmem>>, vector<4x128xf32>
    %1 = vector.shape_cast %0 : vector<4x128xf32> to vector<4x1x128xf32>
    %c0_1 = arith.constant 0 : index
    %c0_2 = arith.constant 0 : index
    %2 = vector.load %arg5[%c0_1, %c0_2] : memref<4x128xf32, #tpu.memory_space<vmem>>, vector<4x128xf32>
    %3 = vector.shape_cast %2 : vector<4x128xf32> to vector<4x1x128xf32>
    %c0_3 = arith.constant 0 : index
    %c0_4 = arith.constant 0 : index
    %c0_5 = arith.constant 0 : index
    %4 = vector.load %arg2[%c0_3, %c0_4, %c0_5] : memref<4x8x128xf32, #tpu.memory_space<vmem>>, vector<4x8x128xf32>
    %5 = vector.broadcast %1 : vector<4x1x128xf32> to vector<4x8x128xf32>
    %6 = arith.mulf %4, %5 : vector<4x8x128xf32>
    %c0_6 = arith.constant 0 : index
    %c0_7 = arith.constant 0 : index
    %c0_8 = arith.constant 0 : index
    %7 = vector.load %arg3[%c0_6, %c0_7, %c0_8] : memref<4x8x128xf32, #tpu.memory_space<vmem>>, vector<4x8x128xf32>
    %8 = vector.broadcast %3 : vector<4x1x128xf32> to vector<4x8x128xf32>
    %9 = arith.mulf %7, %8 : vector<4x8x128xf32>
    %10 = arith.addf %6, %9 : vector<4x8x128xf32>
    %c0_9 = arith.constant 0 : index
    %c0_10 = arith.constant 0 : index
    %c0_11 = arith.constant 0 : index
    %11 = vector.load %arg6[%c0_9, %c0_10, %c0_11] : memref<4x8x128xf32, #tpu.memory_space<vmem>>, vector<4x8x128xf32>
    tpu.vector_store %arg6[%c0_9, %c0_10, %c0_11], %10 {strides = array<i32>} : memref<4x8x128xf32, #tpu.memory_space<vmem>>, vector<4x8x128xf32>,
    return
  }
  func.func @transform_0(%arg0: i32, %arg1: i32) -> (i32, i32, i32) {
    %c0_i32 = arith.constant 0 : i32
    %c0_i32_0 = arith.constant 0 : i32
    return %arg0, %arg1, %c0_i32 : i32, i32, i32
  }
  func.func @transform_1(%arg0: i32, %arg1: i32) -> (i32, i32, i32) {
    %c0_i32 = arith.constant 0 : i32
    %c0_i32_0 = arith.constant 0 : i32
    return %arg0, %arg1, %c0_i32 : i32, i32, i32
  }
  func.func @transform_2(%arg0: i32, %arg1: i32) -> (i32, i32) {
    %c0_i32 = arith.constant 0 : i32
    %c0_i32_0 = arith.constant 0 : i32
    return %arg0, %c0_i32 : i32, i32
  }
  func.func @transform_3(%arg0: i32, %arg1: i32) -> (i32, i32) {
    %c0_i32 = arith.constant 0 : i32
    %c0_i32_0 = arith.constant 0 : i32
    return %arg0, %c0_i32 : i32, i32
  }
  func.func @transform_4(%arg0: i32, %arg1: i32) -> (i32, i32, i32) {
    %c0_i32 = arith.constant 0 : i32
    %c0_i32_0 = arith.constant 0 : i32
    return %arg0, %arg1, %c0_i32 : i32, i32, i32
  }
}

</mosaic_0001>

<bundles_post_ra>
// kernel: tpu_custom_call.1
= control target key start
LH: loop header
LB: loop body
LE: loop exit
PB: predicated region body
PF: predicated region fallthrough
CT: control target
= control target key end

     0   :  { %9 = vsyncpa [#allocation3], 0  ;;  %s342_s0 = inlined_call_operand.hbm [shape: f32[4,8,128], index: 0, kind: input, shape index: {}]   ;;  %s343_s1 = inlined_call_operand.hbm [shape: f32[4,8,128], index: 1, kind: input, shape index: {}]   ;;  %s344_s2 = inlined_call_operand.vmem [shape: f32[4,128], index: 2, kind: input, shape index: {}]   ;;  %s345_s3 = inlined_call_operand.vmem [shape: f32[4,128], index: 3, kind: input, shape index: {}]   ;;  %s346_s4 = inlined_call_operand.hbm [shape: f32[4,8,128], index: 4, kind: output, shape index: {}]  }
   0x1   :  { %10 = vsyncpa [#allocation6], 0 }
   0x2   :  { %11 = vsyncpa [#allocation4], 0  ;;  %s260_s15 = smov [#allocation2]   ;;  %s188_s19 = scalar_lea.hbm %s342_s0, 512 }
   0x3   :  { %s17_s16 = sshll.u32 %s260_s15, 4  ;;  %p189_p0 = scmp.ne.s32.totalorder %s342_s0, %s188_s19  ;;  %s18_s16 = int_to_ptr.vmem [resolvable:$true] %s17_s16 }
   0x4   :  { %p192_p1 = scmp.lt.u32.totalorder %s188_s19, %s342_s0 }
   0x6   :  { %p194_p2 = pnand %p192_p1, %p189_p0 }
   0x8   :  { %197 = shalt.err (!%p194_p2)
}
   0x9   :  { %s198_s24 = scalar_lea.vmem %s18_s16, 512  ;;  %p203_p4 = scmp.lt.s32.totalorder %s18_s16, %s18_s16 }
   0xa   :  { %p199_p3 = scmp.ne.s32.totalorder %s18_s16, %s198_s24  ;;  %p204_p5 = scmp.lt.s32.totalorder %s198_s24, %s198_s24 }
   0xc   :  { %p205_p6 = por %p204_p5, %p203_p4 }
   0xe   :  { %p206_p7 = pnand %p205_p6, %p199_p3 }
  0x10   :  { %209 = shalt.err (!%p206_p7)
}
  0x11   :  { %s261_s25 = smov 128   ;;  %s262_s26 = smov 8  }
  0x12   :  { %23 = dma.hbm_to_vmem [thread:$0]  %s342_s0, 512, %s18_s16, [#allocation3], %s261_s25, %s261_s25, %s262_s26  }
  0x13   :  { %s263_s29 = smov [#allocation5]   ;;  %s210_s7 = scalar_lea.hbm %s343_s1, 512 }
  0x14   :  { %s29_s30 = sshll.u32 %s263_s29, 4  ;;  %p211_p8 = scmp.ne.s32.totalorder %s343_s1, %s210_s7  ;;  %s30_s30 = int_to_ptr.vmem [resolvable:$true] %s29_s30 }
  0x15   :  { %p214_p9 = scmp.lt.u32.totalorder %s210_s7, %s343_s1 }
  0x17   :  { %p216_p10 = pnand %p214_p9, %p211_p8 }
  0x19   :  { %219 = shalt.err (!%p216_p10)
}
  0x1a   :  { %s220_s12 = scalar_lea.vmem %s30_s30, 512  ;;  %p225_p12 = scmp.lt.s32.totalorder %s30_s30, %s30_s30 }
  0x1b   :  { %p221_p11 = scmp.ne.s32.totalorder %s30_s30, %s220_s12  ;;  %p226_p13 = scmp.lt.s32.totalorder %s220_s12, %s220_s12 }
  0x1d   :  { %p227_p0 = por %p226_p13, %p225_p12 }
  0x1f   :  { %p228_p1 = pnand %p227_p0, %p221_p11 }
  0x21   :  { %231 = shalt.err (!%p228_p1)
}
  0x22   :  { %35 = dma.hbm_to_vmem [thread:$0]  %s343_s1, 512, %s30_s30, [#allocation6], %s261_s25, %s261_s25, %s262_s26  }
  0x23   :  { %254 = dma.done.wait [#allocation3], 512  }
  0x24   :  { %255 = vsyncadd [#allocation3], 4294966784 }
  0x25   :  { %256 = dma.done.wait [#allocation6], 512  }
  0x26   :  { %257 = vsyncadd [#allocation6], 4294966784  ;;  %v59_v0 = vlaneseq  ;;  %v264_v1 = vmov 1966171168   ;;  %v98_v12 = vld [vmem:[#allocation2] sm:$0xff]  ;;  %v99_v20 = vld [vmem:[#allocation2 + $0x8] sm:$0xff] }
  0x27   :  { %v57_v2 = vunpack.c.l.s4 %v264_v1  ;;  %v180_v7 = vld.sshfl [vmem:[%s344_s2] sm:$0x33 pattern:$0x75316420]  ;;  %v100_v22 = vld [vmem:[#allocation2 + $0x10] sm:$0xff]  ;;  %v127_v25 = vld [vmem:[#allocation5 + $0x8] sm:$0xff] }
  0x28   :  { %v60_v3 = vshrl.u32 %v59_v0, 7  ;;  %v181_v9 = vld.sshfl [vmem:[%s345_s3] sm:$0x33 pattern:$0x75316420]  ;;  %v55_v10 = vcombine.high %v180_v7, %v180_v7  ;;  %v128_v27 = vld [vmem:[#allocation5 + $0x10] sm:$0xff] }
  0x29   :  { %v58_v4 = vunpack.c.0.s8 %v57_v2  ;;  %v81_v13 = vcombine.high %v181_v9, %v181_v9  ;;  %v126_v15 = vld [vmem:[#allocation5] sm:$0xff]  ;;  %v101_v33 = vld [vmem:[#allocation2 + $0x18] sm:$0xff]  ;;  %s265_s1 = smov [#allocation7]  }
  0x2a   :  { %v104_v6 = vsub.s32 0, %v60_v3  ;;  %v129_v37 = vld [vmem:[#allocation5 + $0x18] sm:$0xff]  ;;  %s167_s2 = sshll.u32 %s265_s1, 4  ;;  %s168_s2 = int_to_ptr.vmem [resolvable:$true] %s167_s2 }
  0x2b   :  { %v61_v5 = vsub.s32 %v58_v4, %v60_v3  ;;  %s232_s3 = scalar_lea.vmem %s168_s2, 512  ;;  %p237_p3 = scmp.lt.s32.totalorder %s168_s2, %s168_s2 }
  0x2c   :  { %p233_p2 = scmp.ne.s32.totalorder %s168_s2, %s232_s3  ;;  %p238_p4 = scmp.lt.s32.totalorder %s232_s3, %s232_s3 }
  0x2d   :  { %v62_v8 = vrot.slane %v180_v7, %v61_v5  ;;  %v88_v11 = vrot.slane %v181_v9, %v61_v5  ;;  %v69_v16 = vrot.slane %v55_v10, %v61_v5  ;;  %v95_v19 = vrot.slane %v81_v13, %v61_v5 }
  0x2e   :  { %p239_p5 = por %p238_p4, %p237_p3 }
  0x2f   :  { %v105_v14 = vrot.slane %v62_v8, %v104_v6  ;;  %v70_v17 = vcombine.high %v62_v8, %v62_v8  ;;  %v133_v18 = vrot.slane %v88_v11, %v104_v6  ;;  %v96_v21 = vcombine.high %v88_v11, %v88_v11 }
  0x30   :  { %v109_v24 = vrot.slane %v69_v16, %v104_v6  ;;  %v71_v28 = vcombine.high %v69_v16, %v69_v16  ;;  %v137_v30 = vrot.slane %v95_v19, %v104_v6  ;;  %v97_v32 = vcombine.high %v95_v19, %v95_v19  ;;  %p240_p6 = pnand %p239_p5, %p233_p2 }
  0x31   :  { %v122_v23 = vmul.f32 %v105_v14, %v98_v12  ;;  %v113_v26 = vrot.slane %v70_v17, %v104_v6  ;;  %v150_v29 = vmul.f32 %v133_v18, %v126_v15  ;;  %v141_v31 = vrot.slane %v96_v21, %v104_v6 }
  0x32   :  { %v123_v34 = vmul.f32 %v109_v24, %v99_v20  ;;  %v117_v36 = vrot.slane %v71_v28, %v104_v6  ;;  %v151_v39 = vmul.f32 %v137_v30, %v127_v25  ;;  %v145_v41 = vrot.slane %v97_v32, %v104_v6 }
  0x33   :  { %v124_v35 = vmul.f32 %v113_v26, %v100_v22  ;;  %v154_v38 = vadd.f32 %v150_v29, %v122_v23  ;;  %v152_v40 = vmul.f32 %v141_v31, %v128_v27 }
  0x34   :  { %v125_v42 = vmul.f32 %v117_v36, %v101_v33  ;;  %v155_v43 = vadd.f32 %v151_v39, %v123_v34  ;;  %v153_v45 = vmul.f32 %v145_v41, %v129_v37 }
  0x35   :  { %158 = vst [vmem:[#allocation7] sm:$0xff] %v154_v38  ;;  %v156_v44 = vadd.f32 %v152_v40, %v124_v35 }
  0x36   :  { %159 = vst [vmem:[#allocation7 + $0x8] sm:$0xff] %v155_v43  ;;  %v157_v46 = vadd.f32 %v153_v45, %v125_v42 }
  0x37   :  { %160 = vst [vmem:[#allocation7 + $0x10] sm:$0xff] %v156_v44 }
  0x38   :  { %161 = vst [vmem:[#allocation7 + $0x18] sm:$0xff] %v157_v46 }
  0x39   :  { %243 = shalt.err (!%p240_p6)
}
  0x3a   :  { %s244_s20 = scalar_lea.hbm %s346_s4, 512 }
  0x3b   :  { %p245_p7 = scmp.ne.s32.totalorder %s346_s4, %s244_s20  ;;  %p248_p8 = scmp.lt.u32.totalorder %s244_s20, %s346_s4 }
  0x3d   :  { %p250_p9 = pnand %p248_p8, %p245_p7 }
  0x3f   :  { %253 = shalt.err (!%p250_p9)
}
  0x40   :  { %173 = dma.vmem_to_hbm [thread:$0]  %s168_s2, 512, %s346_s4, [#allocation4], %s261_s25, %s261_s25, %s262_s26  }
  0x41   :  { %258 = dma.done.wait [#allocation4], 512  }
  0x42   :  { %259 = vsyncadd [#allocation4], 4294966784 }
  0x43   :  { %177 = vsyncpa [#allocation3], 1 }
  0x44   :  { %178 = vsyncpa [#allocation6], 1 }
  0x45   :  { %179 = vsyncpa [#allocation4], 1 }

</bundles_post_ra>
